<compile_context>
chip_gen: v5e
topology: v5e:2x2
jax: 0.10.0
libtpu: 0.0.40
codegen_flags: <defaults>
</compile_context>

<pallas_src>
import functools

import jax
import jax.numpy as jnp
from jax import lax
from jax.experimental import pallas as pl
from jax.experimental.pallas import tpu as pltpu


def _sepconv_kernel(x_ref, dwt_ref, pwb_ref, o_ref, *,
                    n_ch, kh_size, kw_size, stride, dilation, h_out, w_out):
    # x_ref  : (1, Hp, Wp*C)      padded input, channels interleaved on the lane axis
    # dwt_ref: (KH*KW, Wd*C)      depthwise weights, each tap tiled along W
    # pwb_ref: (Wo*C, Wo*Cout)    kron(I_Wo, pw): block-diagonal pointwise weights
    # o_ref  : (1, Ho, Wo*Cout)   lane-dense output tile (minor dim = 128 here)
    hd = (h_out - 1) * stride + 1     # stride-1 row span needed
    wd = (w_out - 1) * stride + 1     # stride-1 col span needed (in W units)

    # Depthwise conv: ref-offset tap loads + VPU FMAs; acc starts from the first tap.
    acc = None
    tap = 0
    for kh in range(kh_size):
        for kw in range(kw_size):
            patch = x_ref[0,
                          pl.ds(kh * dilation, hd),
                          pl.ds(kw * dilation * n_ch, wd * n_ch)]      # (Hd, Wd*C)
            w_row = dwt_ref[pl.ds(tap, 1), :]                           # (1, Wd*C)
            contrib = patch * w_row
            acc = contrib if acc is None else acc + contrib
            tap += 1

    if stride > 1:
        # TODO(synk): stride>1 subsamples the stride-1 accumulator (value-level relayout);
        # Xception's SeparableConv2d always uses stride=1, which is the fast path above.
        acc = acc[::stride, :]
        acc = acc.reshape(h_out, wd, n_ch)[:, ::stride, :].reshape(h_out, w_out * n_ch)

    # Pointwise 1x1 conv as a single block-diagonal matmul; writes the (Ho, Wo*Cout)
    # tile in its final lane-dense layout.
    y = jnp.dot(acc, pwb_ref[...], preferred_element_type=jnp.float32)
    o_ref[0] = y.astype(o_ref.dtype)


def separable_conv2d(x_nchw, dw_torch, pw_torch, *, stride=1, padding=0, dilation=1):
    """x_nchw: (N, C, H, W); dw_torch: (C, 1, KH, KW); pw_torch: (Cout, C, 1, 1)."""
    n, c, h, w = x_nchw.shape
    kh, kw = int(dw_torch.shape[2]), int(dw_torch.shape[3])
    cout = int(pw_torch.shape[0])
    h_out = (h + 2 * padding - dilation * (kh - 1) - 1) // stride + 1
    w_out = (w + 2 * padding - dilation * (kw - 1) - 1) // stride + 1
    hp, wp = h + 2 * padding, w + 2 * padding
    wd = (w_out - 1) * stride + 1

    # NCHW -> (N, Hp, Wp*C): transpose + pad + reshape fuse into one XLA copy; channels
    # land on the fast lane axis next to W.
    x_lanes = jnp.pad(jnp.transpose(x_nchw, (0, 2, 3, 1)),
                      ((0, 0), (padding, padding), (padding, padding), (0, 0)))
    x_lanes = x_lanes.reshape(n, hp, wp * c)

    # Depthwise weights tiled along the lane axis: dwt[t, w'*C + ch] = dw[ch, kh_t, kw_t].
    dw_tc = jnp.transpose(dw_torch[:, 0, :, :].reshape(c, kh * kw), (1, 0))  # (KH*KW, C)
    dwt = jnp.tile(dw_tc, (1, wd)).astype(x_nchw.dtype)                      # (KH*KW, Wd*C)

    # Pointwise weights as block-diagonal kron(I_Wo, pw): one (Wo*C, Wo*Cout) contraction
    # (K=64, N=128 at this config) applies the 1x1 conv to every output column.
    pw_cc = jnp.transpose(pw_torch[:, :, 0, 0], (1, 0))                      # (C, Cout)
    pwb = jnp.kron(jnp.eye(w_out, dtype=pw_cc.dtype), pw_cc).astype(x_nchw.dtype)

    kernel = functools.partial(
        _sepconv_kernel, n_ch=c, kh_size=kh, kw_size=kw,
        stride=stride, dilation=dilation, h_out=h_out, w_out=w_out)

    out_flat = pl.pallas_call(
        kernel,
        out_shape=jax.ShapeDtypeStruct((n, h_out, w_out * cout), x_nchw.dtype),
        grid=(n,),  # 2 balanced "parallel" steps -> shards across v7x's 2 TensorCores
        in_specs=[
            pl.BlockSpec((1, hp, wp * c), lambda i: (i, 0, 0)),
            pl.BlockSpec((kh * kw, wd * c), lambda i: (0, 0)),
            pl.BlockSpec((w_out * c, w_out * cout), lambda i: (0, 0)),
        ],
        out_specs=pl.BlockSpec((1, h_out, w_out * cout), lambda i: (i, 0, 0)),
        compiler_params=pltpu.CompilerParams(dimension_semantics=("parallel",)),
    )(x_lanes, dwt, pwb)

    # (N, Ho, Wo*Cout) -> NCHW: reshape + transpose fuse into one XLA copy.
    # TODO(synk): for large images add an output-row grid axis with a dilation*(KH-1)
    # halo so the per-step block stays inside v7x's 64 MiB VMEM.
    return jnp.transpose(out_flat.reshape(n, h_out, w_out, cout), (0, 3, 1, 2))


def _reference(x, dw_torch, pw_torch, stride, padding, dilation):
    y = lax.conv_general_dilated(
        x, dw_torch, (stride, stride),
        [(padding, padding), (padding, padding)],
        rhs_dilation=(dilation, dilation),
        dimension_numbers=("NCHW", "OIHW", "NCHW"),
        feature_group_count=x.shape[1])
    y = lax.conv_general_dilated(
        y, pw_torch, (1, 1), [(0, 0), (0, 0)],
        dimension_numbers=("NCHW", "OIHW", "NCHW"))
    return y


if __name__ == "__main__":
    # SeparableConv2d(in_channels=4, out_channels=8, kernel_size=3, stride=1,
    #                 padding=1, dilation=1, bias=False)
    N, C_IN, H, W = 2, 4, 16, 16
    C_OUT, K, STRIDE, PAD, DIL = 8, 3, 1, 1, 1

    key = jax.random.PRNGKey(0)
    kx, kdw, kpw = jax.random.split(key, 3)
    x = jax.random.normal(kx, (N, C_IN, H, W), dtype=jnp.float32)
    # torch-shaped weights: conv1.weight (C_in, 1, K, K), pointwise.weight (C_out, C_in, 1, 1)
    dw_w = 0.1 * jax.random.normal(kdw, (C_IN, 1, K, K), dtype=jnp.float32)
    pw_w = 0.1 * jax.random.normal(kpw, (C_OUT, C_IN, 1, 1), dtype=jnp.float32)

    out = jax.block_until_ready(
        separable_conv2d(x, dw_w, pw_w, stride=STRIDE, padding=PAD, dilation=DIL))

    ref = jax.block_until_ready(_reference(x, dw_w, pw_w, STRIDE, PAD, DIL))
    assert out.shape == ref.shape, (out.shape, ref.shape)
    assert jnp.allclose(out, ref, atol=1e-4, rtol=1e-4), float(jnp.abs(out - ref).max())
    print("KERNEL_OK")
</pallas_src>

<mosaic_0001>
module attributes {stable_mosaic.version = 11 : i64} {
  func.func @_sepconv_kernel(%arg0: i32, %arg1: memref<1x18x72xf32, #tpu.memory_space<vmem>>, %arg2: memref<9x64xf32, #tpu.memory_space<vmem>>, %arg3: memref<64x128xf32, #tpu.memory_space<vmem>>, %arg4: memref<1x16x128xf32, #tpu.memory_space<vmem>>) attributes {dimension_semantics = [#tpu.dimension_semantics<parallel>], iteration_bounds = array<i64: 2>, scalar_prefetch = 0 : i64, scratch_operands = 0 : i64, tpu.core_type = #tpu.core_type<tc>, window_params = [{transform_indices = @transform_0, window_bounds = array<i64: 1, 18, 72>}, {pipeline_mode = #tpu.pipeline_mode<synchronous>, transform_indices = @transform_1, window_bounds = array<i64: 9, 64>}, {pipeline_mode = #tpu.pipeline_mode<synchronous>, transform_indices = @transform_2, window_bounds = array<i64: 64, 128>}, {transform_indices = @transform_3, window_bounds = array<i64: 1, 16, 128>}]} {
    %c0 = arith.constant 0 : index
    %c0_0 = arith.constant 0 : index
    %c0_1 = arith.constant 0 : index
    %0 = vector.load %arg1[%c0, %c0_0, %c0_1] : memref<1x18x72xf32, #tpu.memory_space<vmem>>, vector<1x16x64xf32>
    %1 = vector.shape_cast %0 : vector<1x16x64xf32> to vector<16x64xf32>
    %c0_2 = arith.constant 0 : index
    %c0_3 = arith.constant 0 : index
    %2 = vector.load %arg2[%c0_2, %c0_3] : memref<9x64xf32, #tpu.memory_space<vmem>>, vector<1x64xf32>
    %3 = vector.broadcast %2 : vector<1x64xf32> to vector<16x64xf32>
    %4 = arith.mulf %1, %3 : vector<16x64xf32>
    %c0_4 = arith.constant 0 : index
    %c0_5 = arith.constant 0 : index
    %c4 = arith.constant 4 : index
    %5 = vector.load %arg1[%c0_4, %c0_5, %c4] : memref<1x18x72xf32, #tpu.memory_space<vmem>>, vector<1x16x64xf32>
    %6 = vector.shape_cast %5 : vector<1x16x64xf32> to vector<16x64xf32>
    %c1 = arith.constant 1 : index
    %c0_6 = arith.constant 0 : index
    %7 = vector.load %arg2[%c1, %c0_6] : memref<9x64xf32, #tpu.memory_space<vmem>>, vector<1x64xf32>
    %8 = vector.broadcast %7 : vector<1x64xf32> to vector<16x64xf32>
    %9 = arith.mulf %6, %8 : vector<16x64xf32>
    %10 = arith.addf %4, %9 : vector<16x64xf32>
    %c0_7 = arith.constant 0 : index
    %c0_8 = arith.constant 0 : index
    %c8 = arith.constant 8 : index
    %11 = vector.load %arg1[%c0_7, %c0_8, %c8] : memref<1x18x72xf32, #tpu.memory_space<vmem>>, vector<1x16x64xf32>
    %12 = vector.shape_cast %11 : vector<1x16x64xf32> to vector<16x64xf32>
    %c2 = arith.constant 2 : index
    %c0_9 = arith.constant 0 : index
    %13 = vector.load %arg2[%c2, %c0_9] : memref<9x64xf32, #tpu.memory_space<vmem>>, vector<1x64xf32>
    %14 = vector.broadcast %13 : vector<1x64xf32> to vector<16x64xf32>
    %15 = arith.mulf %12, %14 : vector<16x64xf32>
    %16 = arith.addf %10, %15 : vector<16x64xf32>
    %c0_10 = arith.constant 0 : index
    %c1_11 = arith.constant 1 : index
    %c0_12 = arith.constant 0 : index
    %17 = vector.load %arg1[%c0_10, %c1_11, %c0_12] : memref<1x18x72xf32, #tpu.memory_space<vmem>>, vector<1x16x64xf32>
    %18 = vector.shape_cast %17 : vector<1x16x64xf32> to vector<16x64xf32>
    %c3 = arith.constant 3 : index
    %c0_13 = arith.constant 0 : index
    %19 = vector.load %arg2[%c3, %c0_13] : memref<9x64xf32, #tpu.memory_space<vmem>>, vector<1x64xf32>
    %20 = vector.broadcast %19 : vector<1x64xf32> to vector<16x64xf32>
    %21 = arith.mulf %18, %20 : vector<16x64xf32>
    %22 = arith.addf %16, %21 : vector<16x64xf32>
    %c0_14 = arith.constant 0 : index
    %c1_15 = arith.constant 1 : index
    %c4_16 = arith.constant 4 : index
    %23 = vector.load %arg1[%c0_14, %c1_15, %c4_16] : memref<1x18x72xf32, #tpu.memory_space<vmem>>, vector<1x16x64xf32>
    %24 = vector.shape_cast %23 : vector<1x16x64xf32> to vector<16x64xf32>
    %c4_17 = arith.constant 4 : index
    %c0_18 = arith.constant 0 : index
    %25 = vector.load %arg2[%c4_17, %c0_18] : memref<9x64xf32, #tpu.memory_space<vmem>>, vector<1x64xf32>
    %26 = vector.broadcast %25 : vector<1x64xf32> to vector<16x64xf32>
    %27 = arith.mulf %24, %26 : vector<16x64xf32>
    %28 = arith.addf %22, %27 : vector<16x64xf32>
    %c0_19 = arith.constant 0 : index
    %c1_20 = arith.constant 1 : index
    %c8_21 = arith.constant 8 : index
    %29 = vector.load %arg1[%c0_19, %c1_20, %c8_21] : memref<1x18x72xf32, #tpu.memory_space<vmem>>, vector<1x16x64xf32>
    %30 = vector.shape_cast %29 : vector<1x16x64xf32> to vector<16x64xf32>
    %c5 = arith.constant 5 : index
    %c0_22 = arith.constant 0 : index
    %31 = vector.load %arg2[%c5, %c0_22] : memref<9x64xf32, #tpu.memory_space<vmem>>, vector<1x64xf32>
    %32 = vector.broadcast %31 : vector<1x64xf32> to vector<16x64xf32>
    %33 = arith.mulf %30, %32 : vector<16x64xf32>
    %34 = arith.addf %28, %33 : vector<16x64xf32>
    %c0_23 = arith.constant 0 : index
    %c2_24 = arith.constant 2 : index
    %c0_25 = arith.constant 0 : index
    %35 = vector.load %arg1[%c0_23, %c2_24, %c0_25] : memref<1x18x72xf32, #tpu.memory_space<vmem>>, vector<1x16x64xf32>
    %36 = vector.shape_cast %35 : vector<1x16x64xf32> to vector<16x64xf32>
    %c6 = arith.constant 6 : index
    %c0_26 = arith.constant 0 : index
    %37 = vector.load %arg2[%c6, %c0_26] : memref<9x64xf32, #tpu.memory_space<vmem>>, vector<1x64xf32>
    %38 = vector.broadcast %37 : vector<1x64xf32> to vector<16x64xf32>
    %39 = arith.mulf %36, %38 : vector<16x64xf32>
    %40 = arith.addf %34, %39 : vector<16x64xf32>
    %c0_27 = arith.constant 0 : index
    %c2_28 = arith.constant 2 : index
    %c4_29 = arith.constant 4 : index
    %41 = vector.load %arg1[%c0_27, %c2_28, %c4_29] : memref<1x18x72xf32, #tpu.memory_space<vmem>>, vector<1x16x64xf32>
    %42 = vector.shape_cast %41 : vector<1x16x64xf32> to vector<16x64xf32>
    %c7 = arith.constant 7 : index
    %c0_30 = arith.constant 0 : index
    %43 = vector.load %arg2[%c7, %c0_30] : memref<9x64xf32, #tpu.memory_space<vmem>>, vector<1x64xf32>
    %44 = vector.broadcast %43 : vector<1x64xf32> to vector<16x64xf32>
    %45 = arith.mulf %42, %44 : vector<16x64xf32>
    %46 = arith.addf %40, %45 : vector<16x64xf32>
    %c0_31 = arith.constant 0 : index
    %c2_32 = arith.constant 2 : index
    %c8_33 = arith.constant 8 : index
    %47 = vector.load %arg1[%c0_31, %c2_32, %c8_33] : memref<1x18x72xf32, #tpu.memory_space<vmem>>, vector<1x16x64xf32>
    %48 = vector.shape_cast %47 : vector<1x16x64xf32> to vector<16x64xf32>
    %c8_34 = arith.constant 8 : index
    %c0_35 = arith.constant 0 : index
    %49 = vector.load %arg2[%c8_34, %c0_35] : memref<9x64xf32, #tpu.memory_space<vmem>>, vector<1x64xf32>
    %50 = vector.broadcast %49 : vector<1x64xf32> to vector<16x64xf32>
    %51 = arith.mulf %48, %50 : vector<16x64xf32>
    %52 = arith.addf %46, %51 : vector<16x64xf32>
    %c0_36 = arith.constant 0 : index
    %c0_37 = arith.constant 0 : index
    %53 = vector.load %arg3[%c0_36, %c0_37] : memref<64x128xf32, #tpu.memory_space<vmem>>, vector<64x128xf32>
    %cst = arith.constant dense<0.000000e+00> : vector<16x128xf32>
    %54 = tpu.matmul %52, %53, %cst {dimension_numbers = #tpu.dot_dimension_numbers<[1], [0], [0], [1], [0, 0, 1, 1], [], []>} : vector<16x64xf32>, vector<64x128xf32>, vector<16x128xf32> -> vector<16x128xf32>
    %c0_38 = arith.constant 0 : index
    %c0_39 = arith.constant 0 : index
    %c0_40 = arith.constant 0 : index
    %55 = vector.load %arg4[%c0_38, %c0_39, %c0_40] : memref<1x16x128xf32, #tpu.memory_space<vmem>>, vector<1x16x128xf32>
    %56 = vector.shape_cast %55 : vector<1x16x128xf32> to vector<16x128xf32>
    %57 = vector.shape_cast %54 : vector<16x128xf32> to vector<1x16x128xf32>
    tpu.vector_store %arg4[%c0_38, %c0_39, %c0_40], %57 {strides = array<i32>} : memref<1x16x128xf32, #tpu.memory_space<vmem>>, vector<1x16x128xf32>,
    return
  }
  func.func @transform_0(%arg0: i32) -> (i32, i32, i32) {
    %c0_i32 = arith.constant 0 : i32
    %c0_i32_0 = arith.constant 0 : i32
    %c0_i32_1 = arith.constant 0 : i32
    return %arg0, %c0_i32, %c0_i32_0 : i32, i32, i32
  }
  func.func @transform_1(%arg0: i32) -> (i32, i32) {
    %c0_i32 = arith.constant 0 : i32
    %c0_i32_0 = arith.constant 0 : i32
    %c0_i32_1 = arith.constant 0 : i32
    return %c0_i32, %c0_i32_0 : i32, i32
  }
  func.func @transform_2(%arg0: i32) -> (i32, i32) {
    %c0_i32 = arith.constant 0 : i32
    %c0_i32_0 = arith.constant 0 : i32
    %c0_i32_1 = arith.constant 0 : i32
    return %c0_i32, %c0_i32_0 : i32, i32
  }
  func.func @transform_3(%arg0: i32) -> (i32, i32, i32) {
    %c0_i32 = arith.constant 0 : i32
    %c0_i32_0 = arith.constant 0 : i32
    %c0_i32_1 = arith.constant 0 : i32
    return %arg0, %c0_i32, %c0_i32_0 : i32, i32, i32
  }
}

</mosaic_0001>

<bundles_post_ra>
// kernel: tpu_custom_call.1
= control target key start
LH: loop header
LB: loop body
LE: loop exit
PB: predicated region body
PF: predicated region fallthrough
CT: control target
= control target key end

     0   :  { %8 = vsyncpa [#allocation3], 0  ;;  %s737_s0 = inlined_call_operand.vmem [shape: f32[2,18,72], index: 0, kind: input, shape index: {}]   ;;  %s738_s1 = inlined_call_operand.vmem [shape: f32[9,64], index: 1, kind: input, shape index: {}]   ;;  %s739_s2 = inlined_call_operand.vmem [shape: f32[64,128], index: 2, kind: input, shape index: {}]   ;;  %s740_s3 = inlined_call_operand.hbm [shape: f32[2,16,128], index: 3, kind: output, shape index: {}]  }
   0x1   :  { %10 = vsyncpa [#allocation3 + $0x1], 0  ;;  %s582_s12 = smov 0   ;;  %s584_s13 = smov 0  }
   0x2   :  { %s586_s14 = smov 0   ;;  %s588_s15 = smov 0  }
   0x3 LB: > { %s603_s16 = sadd.s32 4294967295, %s555_s15   ;;  %s417_s17 = sadd.s32 4294967294, %s555_s15   ;;  %s555_s15 = sphi %s588_s15, %s746_s15   ;;  %s551_s14 = sphi %s586_s14, %s745_s14   ;;  %s547_s13 = sphi %s584_s13, %s744_s13   ;;  %s543_s12 = sphi %s582_s12, %s743_s12  }
   0x4   : > { %s607_s18 = sadd.s32 1, %s555_s15   ;;  %s91_s19 = sadd.s32 1, %s551_s14 }
   0x5   : > { %s88_s20 = ssub.s32 %s555_s15, %s607_s18  ;;  %p101_p0 = scmp.ne.s32.totalorder %s551_s14, %s547_s13 }
   0x6   : > { %p89_p1 = scmp.eq.s32.totalorder %s88_s20, 0  ;;  %p102_p2 = scmp.eq.s32.totalorder %s603_s16, 1 }
   0x7   : > { %p107_p3 = scmp.ne.s32.totalorder %s547_s13, %s543_s12  ;;  %p108_p4 = scmp.eq.s32.totalorder %s417_s17, 1 }
   0x8   : > { %s618_s21 = scalar_select %p89_p1, %s551_s14, %s91_s19  }
   0x9   : > { %p620_p5 = por %p102_p2, %p101_p0  ;;  %p624_p6 = por %p108_p4, %p107_p3 }
   0xa   : > { %p420_p7 = scmp.ge.s32.totalorder %s555_s15, 1  ;;  %p140_p8 = scmp.lt.s32.totalorder %s555_s15, 3 }
   0xc   : > { %p141_p9 = pnand %p420_p7, %p140_p8 }
   0xd   : > { %s557_s28 = smov (!%p141_p9), 4   ;;  %s558_s10 = smov (!%p141_p9), 8  }
   0xe   : > { %144 = sbr.rel (%p141_p9) target bundleno = 411 (0x19b), region = 32  ;;  %p164_p10 = scmp.lt.s32.totalorder (!%p141_p9), %s603_s16, 1 }
   0xf   : > { %s559_s25 = smov (!%p141_p9), 124   ;;  %s560_s26 = smov (!%p141_p9), 120  }
  0x10   : > { %s161_s5 = sand.u32 (!%p141_p9), 1, %s547_s13   ;;  %s430_s7 = sshll.u32 (!%p141_p9), %s603_s16, 4 }
  0x11   : > { %s421_s6 = sshll.u32 (!%p141_p9), %s161_s5, 4 }
  0x13   : > { %v484_v0 = vld [vmem:[%s738_s1 + $0x1] ss:$0 sm:$0xff]  ;;  %v485_v1 = vld [vmem:[%s738_s1 + $0x4] ss:$0 sm:$0xff]  ;;  %v488_v2 = vld [vmem:[%s738_s1 + $0x7] ss:$0 sm:$0xff] }
  0x14   : > { %178 = vrot.lane.b32.xlu0 %v484_v0, %s557_s28  ;;  %222 = vrot.lane.b32.xlu1 %v485_v1, %s557_s28  ;;  %v486_v3 = vld [vmem:[%s738_s1 + $0x2] ss:$0 sm:$0xff]  ;;  %v487_v4 = vld [vmem:[%s738_s1 + $0x5] ss:$0 sm:$0xff]  ;;  %s165_s11 = scalar_select %p164_p10, %s603_s16, 1  ;;  %vm307_vm0 = vcmask 523264  }
  0x15   : > { %266 = vrot.lane.b32.xlu2 %v488_v2, %s557_s28  ;;  %v489_v5 = vld [vmem:[%s738_s1 + $0x8] ss:$0 sm:$0xff]  ;;  %v306_v30 = vld [vmem:[%s739_s2 + $0x38] sm:$0xff]  ;;  %v305_v31 = vld [vmem:[%s739_s2 + $0x30] sm:$0xff]  ;;  %s513_s28 = scalar_lea.hbm %s740_s3, 32 }
  0x16   : > { %s439_s17 = smul.u32 24, %s165_s11  ;;  %322 = vmatpush.msra.mxu0 %v306_v30  ;;  %431 = vmatpush.msra.mxu1 %v306_v30  ;;  %v304_v32 = vld [vmem:[%s739_s2 + $0x28] sm:$0xff]  ;;  %v303_v33 = vld [vmem:[%s739_s2 + $0x20] sm:$0xff]  ;;  %v302_v34 = vld [vmem:[%s739_s2 + $0x18] sm:$0xff]  ;;  %s351_s11 = scalar_lea.hbm %s740_s3, %s430_s7 }
  0x17   : > { %v301_v35 = vld [vmem:[%s739_s2 + $0x10] sm:$0xff]  ;;  %v300_v36 = vld [vmem:[%s739_s2 + $0x8] sm:$0xff]  ;;  %v299_v37 = vld [vmem:[%s739_s2] sm:$0xff]  ;;  %s354_s20 = sshll.u32 %s351_s11, 4  ;;  %s355_s20 = int_to_ptr.hbm [resolvable:$true] %s354_s20 }
  0x18   : > { %s168_s24 = scalar_lea.vmem %s737_s0, %s439_s17  ;;  %323 = vmatpush.msra.mxu0 %v305_v31  ;;  %432 = vmatpush.msra.mxu1 %v305_v31  ;;  %v490_v39 = vld [vmem:[%s738_s1] ss:$0 sm:$0xff]  ;;  %v491_v45 = vld [vmem:[%s738_s1 + $0x3] ss:$0 sm:$0xff]  ;;  %v492_v54 = vld [vmem:[%s738_s1 + $0x6] ss:$0 sm:$0xff] }
  0x19   : > { %v656_v6 = vld [vmem:[%s168_s24] sm:$0xff]  ;;  %v658_v7 = vld [vmem:[%s168_s24 + $0x8] sm:$0xff]  ;;  %s163_s17 = scalar_lea.vmem [#allocation2], %s421_s6 }
  0x1a   : > { %v662_v12 = vld [vmem:[%s168_s24 + $0x1] sm:$0xff]  ;;  %v212_v19 = vld [vmem:[%s168_s24 + $0x9] sm:$0xff]  ;;  %324 = vmatpush.msra.mxu0 %v304_v32  ;;  %433 = vmatpush.msra.mxu1 %v304_v32  ;;  %v173_v42 = vmul.f32 %v490_v39, %v656_v6  ;;  %v174_v43 = vmul.f32 %v490_v39, %v658_v7  ;;  %s352_s19 = sshll.u32 %s163_s17, 4  ;;  %s353_s19 = int_to_ptr.vmem [resolvable:$true] %s352_s19 }
  0x1b   : > { %v255_v24 = vld [vmem:[%s168_s24 + $0x2] sm:$0xff]  ;;  %v256_v25 = vld [vmem:[%s168_s24 + $0xa] sm:$0xff]  ;;  %v215_v51 = vmul.f32 %v491_v45, %v662_v12  ;;  %v216_v52 = vmul.f32 %v491_v45, %v212_v19  ;;  %s340_s24 = scalar_lea.sflag [#allocation3], %s161_s5 }
  0x1c   : > { %196 = vrot.lane.b32.xlu0 %v486_v3, %s558_s10  ;;  %240 = vrot.lane.b32.xlu1 %v487_v4, %s558_s10  ;;  %v259_v59 = vmul.f32 %v492_v54, %v255_v24  ;;  %v260_v2 = vmul.f32 %v492_v54, %v256_v25 }
  0x1d   : > { %284 = vrot.lane.b32.xlu2 %v489_v5, %s558_s10  ;;  %325 = vmatpush.msra.mxu0 %v303_v33 }
  0x1e   : > { %434 = vmatpush.msra.mxu1 %v303_v33 }
  0x1f   : > { %326 = vmatpush.msra.mxu0 %v302_v34 }
  0x20   : > { %435 = vmatpush.msra.mxu1 %v302_v34 }
  0x21   : > { %327 = vmatpush.msra.mxu0 %v301_v35 }
  0x22   : > { %436 = vmatpush.msra.mxu1 %v301_v35 }
  0x23   : > { %328 = vmatpush.msra.mxu0 %v300_v36 }
  0x24   : > { %437 = vmatpush.msra.mxu1 %v300_v36 }
  0x25   : > { %329 = vmatpush.msra.mxu0 %v299_v37 }
  0x26   : > { %438 = vmatpush.msra.mxu1 %v299_v37 }
  0x6f   : > { %v267_v17 = vpop.permute.xlu2 %266 }
  0x70   : > { %v269_v27 = vmul.f32 %v267_v17, %v255_v24  ;;  %v270_v28 = vmul.f32 %v267_v17, %v256_v25 }
  0x77   : > { %v285_v23 = vpop.permute.xlu2 %284 }
  0x78   : > { %v287_v26 = vmul.f32 %v285_v23, %v255_v24  ;;  %v288_v29 = vmul.f32 %v285_v23, %v256_v25 }
  0x86   : > { %v179_v8 = vpop.permute.xlu0 %178  ;;  %v223_v11 = vpop.permute.xlu1 %222 }
  0x87   : > { %v181_v9 = vmul.f32 %v179_v8, %v656_v6  ;;  %v182_v10 = vmul.f32 %v179_v8, %v658_v7  ;;  %v225_v13 = vmul.f32 %v223_v11, %v662_v12  ;;  %v226_v22 = vmul.f32 %v223_v11, %v212_v19 }
  0x89   : > { %187 = vrot.lane.b32.xlu1 %v182_v10, %s559_s25  ;;  %185 = vrot.lane.b32.xlu0 %v181_v9, %s559_s25 }
  0x8e   : > { %v197_v14 = vpop.permute.xlu0 %196  ;;  %v241_v18 = vpop.permute.xlu1 %240 }
  0x8f   : > { %v199_v15 = vmul.f32 %v197_v14, %v656_v6  ;;  %v200_v16 = vmul.f32 %v197_v14, %v658_v7  ;;  %v244_v20 = vmul.f32 %v241_v18, %v212_v19  ;;  %v243_v21 = vmul.f32 %v241_v18, %v662_v12 }
  0x91   : > { %229 = vrot.lane.b32.xlu1 %v225_v13, %s559_s25  ;;  %203 = vrot.lane.b32.xlu2 %v199_v15, %s560_s26 }
  0x92   : > { %205 = vrot.lane.b32.xlu0 %v200_v16, %s560_s26 }
  0x99   : > { %249 = vrot.lane.b32.xlu1 %v244_v20, %s560_s26  ;;  %231 = vrot.lane.b32.xlu2 %v226_v22, %s559_s25 }
  0x9a   : > { %247 = vrot.lane.b32.xlu0 %v243_v21, %s560_s26 }
  0xa1   : > { %291 = vrot.lane.b32.xlu1 %v287_v26, %s560_s26  ;;  %273 = vrot.lane.b32.xlu2 %v269_v27, %s559_s25 }
  0xa2   : > { %275 = vrot.lane.b32.xlu0 %v270_v28, %s559_s25  ;;  %s507_s25 = sshra.s32 %s355_s20, 4  ;;  %s508_s25 = int_to_ptr.hbm [resolvable:$true] %s507_s25 }
  0xa3   : > { %p514_p0 = scmp.lt.s32.totalorder %s508_s25, %s740_s3 }
  0xa9   : > { %293 = vrot.lane.b32.xlu2 %v288_v29, %s560_s26  ;;  %s509_s26 = scalar_lea.hbm %s508_s25, 16 }
  0xaa   : > { %p510_p11 = scmp.ne.s32.totalorder %s508_s25, %s509_s26  ;;  %p515_p1 = scmp.lt.s32.totalorder %s513_s28, %s509_s26 }
  0xac   : > { %p511_p12 = pnand %p510_p11, %p620_p5  ;;  %p516_p2 = por %p515_p1, %p514_p0 }
  0xae   : > { %p512_p13 = pneg %p511_p12 }
  0xb0   : > { %p517_p3 = pnand %p516_p2, %p512_p13 }
  0xeb   : > { %v204_v38 = vpop.permute.xlu2 %203 }
  0xf3   : > { %v232_v46 = vpop.permute.xlu2 %231 }
  0xfb   : > { %v188_v40 = vpop.permute.xlu1 %187  ;;  %v186_v41 = vpop.permute.xlu0 %185 }
  0xfc   : > { %v191_v44 = vadd.f32 %v186_v41, %v173_v42  ;;  %v192_v47 = vadd.f32 %v188_v40, %v174_v43  ;;  %v274_v60 = vpop.permute.xlu2 %273 }
  0xfe   : > { %v209_v50 = vadd.f32 %v204_v38, %v191_v44 }
 0x100   : > { %v217_v55 = vadd.f32 %v215_v51, %v209_v50 }
 0x103   : > { %v230_v48 = vpop.permute.xlu1 %229 }
 0x104   : > { %v206_v49 = vpop.permute.xlu0 %205  ;;  %v235_v57 = vadd.f32 %v230_v48, %v217_v55  ;;  %v294_v9 = vpop.permute.xlu2 %293 }
 0x105   : > { %v210_v53 = vadd.f32 %v206_v49, %v192_v47 }
 0x107   : > { %v218_v56 = vadd.f32 %v216_v52, %v210_v53 }
 0x109   : > { %v236_v62 = vadd.f32 %v232_v46, %v218_v56 }
 0x10b   : > { %v250_v58 = vpop.permute.xlu1 %249 }
 0x10c   : > { %v248_v61 = vpop.permute.xlu0 %247  ;;  %v254_v0 = vadd.f32 %v250_v58, %v236_v62 }
 0x10d   : > { %v253_v63 = vadd.f32 %v248_v61, %v235_v57 }
 0x10e   : > { %v262_v5 = vadd.f32 %v260_v2, %v254_v0 }
 0x10f   : > { %v261_v1 = vadd.f32 %v259_v59, %v253_v63 }
 0x111   : > { %v279_v3 = vadd.f32 %v274_v60, %v261_v1 }
 0x113   : > { %v292_v4 = vpop.permute.xlu1 %291 }
 0x114   : > { %v297_v6 = vadd.f32 %v292_v4, %v279_v3  ;;  %v276_v7 = vpop.permute.xlu0 %275 }
 0x115   : > { %v280_v8 = vadd.f32 %v276_v7, %v262_v5 }
 0x116   : > { %423 = vmatmul.msk.f32.vlgmr.msra.gmra.mxu0 %vm307_vm0, %v297_v6 }
 0x117   : > { %v298_v10 = vadd.f32 %v294_v9, %v280_v8 }
 0x119   : > { %424 = vmatmul.msk.f32.vlgmr.msra.gmra.mxu1 %vm307_vm0, %v298_v10 }
 0x193   : > { %v331_v11 = vpop.f32.mrf.mxu0 }
 0x194   : > { %337 = vst [vmem:[%s163_s17] sm:$0xff] %v331_v11 }
 0x196   : > { %v334_v12 = vpop.f32.mrf.mxu1 }
 0x197   : > { %338 = vst [vmem:[%s163_s17 + $0x8] sm:$0xff] %v334_v12 }
 0x198   : > { %520 = shalt.err (!%p517_p3)
}
 0x199   : > { %s561_s4 = smov 128  }
 0x19a   : > { %440 = dma.vmem_to_hbm [thread:$0]  (%p620_p5), %s353_s19, 256, %s355_s20, %s340_s24, %s561_s4, %s561_s4, %s558_s10  }
 0x19b PF: > { %p446_p4 = scmp.ge.s32.totalorder %s555_s15, 2  ;;  %s369_s5 = sand.u32 1, %s543_s12  }
 0x19c   : > { %s370_s6 = scalar_lea.sflag [#allocation3], %s369_s5 }
 0x19d   : > { %p443_p7 = pnand %p446_p4, %p624_p6 }
 0x19f   : > { %p444_p8 = pneg %p443_p7 }
 0x1a1   : > { %538 = dma.done.wait (%p444_p8), %s370_s6, 256  }
 0x1a2   : > { %540 = vsyncadd (%p444_p8), %s370_s6, 4294967040  ;;  %p13_p9 = scmp.ge.s32.totalorder %s607_s18, 4   ;;  %s743_s12 = smov %s547_s13 }
 0x1a3   : > { %s744_s13 = smov %s551_s14  ;;  %s745_s14 = smov %s618_s21 }
 0x1a4   : > { %s746_s15 = smov %s607_s18  ;;  %15 = sbr.rel (!%p13_p9) target bundleno = 3 (0x3), region = 67 }
 0x1a9   :  { %376 = vsyncpa [#allocation3], 1 }
 0x1aa   :  { %378 = vsyncpa [#allocation3 + $0x1], 1 }

</bundles_post_ra>
